<compile_context>
chip_gen: v7x
topology: tpu7x:2x2x1
jax: 0.10.0
libtpu: 0.0.40
codegen_flags: <defaults>
</compile_context>

<pallas_src>
import functools

import jax
import jax.numpy as jnp
import numpy as np
from jax import lax
from jax.experimental import pallas as pl
from jax.experimental.pallas import tpu as pltpu

# Contract axis 1 of LHS with axis 1 of RHS (i.e. A @ B^T without a .T).
_CONTRACT_LAST = (((1,), (1,)), ((), ()))

# Scoped-VMEM budget: leaves headroom on v7x (64 MiB/TC physical), far under
# the 128 MiB on v5e/v6e.  Working sets here are < 2 MiB anyway.
_VMEM_LIMIT = 48 * 1024 * 1024


def _round_up(x, m):
    return ((x + m - 1) // m) * m


def _cdiv(a, b):
    return (a + b - 1) // b


def _default_tanh_dtype():
    # bf16 EUP exists on v6e / v7x (~2x packed transcendental throughput);
    # v5e and older chips lack it -> keep f32 there (and when unsure).
    try:
        kind = jax.devices()[0].device_kind.lower()
    except Exception:
        return jnp.float32
    if "v6" in kind or "v7" in kind or "7x" in kind:
        return jnp.bfloat16
    return jnp.float32


def _ensure_two_grid_steps(M, N, tm, tn):
    # v7x has 2 TensorCores: "parallel" grid axes only help if there are >= 2
    # grid steps to shard.  Prefer splitting N (keeps blocks lane-dense).
    if _cdiv(M, tm) * _cdiv(N, tn) < 2:
        if N > 128:
            tn = _round_up(_cdiv(N, 2), 128)
        elif M > 8:
            tm = _round_up(_cdiv(M, 2), 8)
    return tm, tn


# ----------------------------- bilinear branch -----------------------------
# scores = (first @ W^T + b) @ second^T
def _bilinear_score_kernel(f_ref, s_ref, w_ref, b_ref, o_ref):
    # Projection fused in-kernel: one extra tiny matmul per tile on the
    # otherwise-idle MXU instead of an extra launch + HBM round-trip.
    proj = lax.dot_general(f_ref[...], w_ref[...], _CONTRACT_LAST,
                           preferred_element_type=jnp.float32) + b_ref[...]
    # proj @ second^T: contract axis 1 of both operands (no in-kernel .T).
    o_ref[...] = lax.dot_general(proj, s_ref[...], _CONTRACT_LAST,
                                 preferred_element_type=jnp.float32)


def score_bilinear(first, second, w, b, *, tm=None, tn=None):
    M, H = first.shape
    N = second.shape[0]
    if tm is None or tn is None:
        dtm = min(256, _round_up(M, 8))
        dtn = min(512, _round_up(N, 128))
        dtm, dtn = _ensure_two_grid_steps(M, N, dtm, dtn)
        tm = tm or dtm
        tn = tn or dtn
    grid = (_cdiv(M, tm), _cdiv(N, tn))   # ragged edge blocks are clamped

    return pl.pallas_call(
        _bilinear_score_kernel,
        out_shape=jax.ShapeDtypeStruct((M, N), jnp.float32),
        grid=grid,
        in_specs=[
            pl.BlockSpec((tm, H), lambda i, j: (i, 0)),     # first tile
            pl.BlockSpec((tn, H), lambda i, j: (j, 0)),     # second tile
            pl.BlockSpec((H, H), lambda i, j: (0, 0)),      # W (out, in)
            pl.BlockSpec((1, H), lambda i, j: (0, 0)),      # bias
        ],
        out_specs=pl.BlockSpec((tm, tn), lambda i, j: (i, j)),
        compiler_params=pltpu.CompilerParams(
            dimension_semantics=("parallel", "parallel"),
            vmem_limit_bytes=_VMEM_LIMIT),
    )(first, second, w, b.reshape(1, H))


# ------------------------------ concat branch -------------------------------
# PyTorch: single(tanh(concat([first_i ; second_j]) @ Wc^T + bc)) + bs
# Decompose Wc = [Wc1 | Wc2]  =>  concat @ Wc^T = first @ Wc1^T + second @ Wc2^T
# P = first @ Wc1^T + bc  (M, H),  Qt = Wc2 @ second^T  (H, N) (lane-dense)
# s[m, n] = sum_h ws[h] * tanh(P[m, h] + Qt[h, n]) + bs
def _concat_score_kernel(p_ref, qt_ref, ws_ref, bs_ref, o_ref, *, tanh_dtype):
    # Accumulate directly into the output block (VMEM) so the live accumulator
    # never spills the vreg file; the per-h load/store hides under the
    # EUP-bound tanh (v5e has only 1 vst slot, so this matters most there).
    o_ref[...] = jnp.full(o_ref.shape, bs_ref[0], jnp.float32)
    H = p_ref.shape[1]
    for h in range(H):   # H is small & static -> fully unrolled
        arg = p_ref[:, h:h + 1] + qt_ref[h:h + 1, :]          # (tm, tn) f32
        t = jnp.tanh(arg.astype(tanh_dtype)).astype(jnp.float32)
        o_ref[...] += ws_ref[h] * t
    # TODO(synk): if a bundle dump ever shows the XLU (lane-broadcast of
    # p[:, h]) rather than the EUP saturating, move that broadcast onto the
    # idle MXU via a rank-1 matmul per h (or a batched one over several h).


def score_concat(first, second, wc, bc, ws, bs, *, tm=None, tn=None,
                 tanh_dtype=None):
    M, H = first.shape
    N = second.shape[0]
    if tanh_dtype is None:
        tanh_dtype = _default_tanh_dtype()

    wc1 = wc[:, :H]          # acts on first_inputs
    wc2 = wc[:, H:]          # acts on second_inputs

    # Tiny (.,32)@(32,32) projections: plain jnp (XLA fuses them, essentially
    # free) instead of extra Pallas launches + HBM round-trips.  Qt is emitted
    # directly in the lane-dense (H, N) layout -> no transpose pass.
    p = (first @ wc1.T + bc).astype(jnp.float32)       # (M, H)
    qt = (wc2 @ second.T).astype(jnp.float32)          # (H, N)

    if tm is None or tn is None:
        # EUP-bound branch: keep the per-iteration working set modest.
        dtm = min(128, _round_up(M, 8))
        dtn = min(512, _round_up(N, 128))
        dtm, dtn = _ensure_two_grid_steps(M, N, dtm, dtn)
        tm = tm or dtm
        tn = tn or dtn
    grid = (_cdiv(M, tm), _cdiv(N, tn))   # ragged edge blocks are clamped

    kernel = functools.partial(_concat_score_kernel, tanh_dtype=tanh_dtype)
    return pl.pallas_call(
        kernel,
        out_shape=jax.ShapeDtypeStruct((M, N), jnp.float32),
        grid=grid,
        in_specs=[
            pl.BlockSpec((tm, H), lambda i, j: (i, 0)),          # P tile
            pl.BlockSpec((H, tn), lambda i, j: (0, j)),          # Qt tile
            pl.BlockSpec(memory_space=pltpu.MemorySpace.SMEM),   # ws (H,)
            pl.BlockSpec(memory_space=pltpu.MemorySpace.SMEM),   # bs (1,)
        ],
        out_specs=pl.BlockSpec((tm, tn), lambda i, j: (i, j)),
        compiler_params=pltpu.CompilerParams(
            dimension_semantics=("parallel", "parallel"),
            vmem_limit_bytes=_VMEM_LIMIT),
    )(p, qt, ws.reshape(H).astype(jnp.float32),
      bs.reshape(1).astype(jnp.float32))


# ------------------------------ parameter init ------------------------------
def xavier_uniform(key, shape):
    fan_out, fan_in = shape
    limit = np.sqrt(6.0 / (fan_in + fan_out))
    return jax.random.uniform(key, shape, jnp.float32, -limit, limit)


def linear_bias(key, fan_in, n_out):
    bound = 1.0 / np.sqrt(fan_in)
    return jax.random.uniform(key, (n_out,), jnp.float32, -bound, bound)


# --------------------------------- reference ---------------------------------
def ref_bilinear(first, second, w, b):
    return (first @ w.T + b) @ second.T


def ref_concat(first, second, wc, bc, ws, bs):
    M, N = first.shape[0], second.shape[0]
    cat = jnp.concatenate(
        [jnp.broadcast_to(first[:, None, :], (M, N, first.shape[1])),
         jnp.broadcast_to(second[None, :, :], (M, N, second.shape[1]))],
        axis=-1)                                                   # (M, N, 2H)
    h = jnp.tanh(cat @ wc.T + bc)                                  # (M, N, H)
    return (h @ ws.T + bs).squeeze(-1)                             # (M, N)


if __name__ == "__main__":
    key = jax.random.PRNGKey(0)
    ks = jax.random.split(key, 8)

    M, N, H = 8, 8, 32   # num_attendees, num_attenders, hidden_size

    first = jax.random.normal(ks[0], (M, H), jnp.float32)
    second = jax.random.normal(ks[1], (N, H), jnp.float32)

    # bilinear params: nn.Linear(H, H)
    w_bi = xavier_uniform(ks[2], (H, H))
    b_bi = linear_bias(ks[3], H, H)

    # concat params: nn.Linear(2H, H) and nn.Linear(H, 1)
    w_cat = xavier_uniform(ks[4], (H, 2 * H))
    b_cat = linear_bias(ks[5], 2 * H, H)
    w_single = xavier_uniform(ks[6], (1, H))
    b_single = linear_bias(ks[7], H, 1)

    auto_dtype = _default_tanh_dtype()
    cat_tol = (dict(rtol=1e-4, atol=1e-4) if auto_dtype == jnp.float32
               else dict(rtol=5e-2, atol=5e-2))   # bf16-tanh path is looser

    # ---- small shapes (single grid step, partial lane blocks) ----
    out_bi = jax.block_until_ready(score_bilinear(first, second, w_bi, b_bi))
    out_cat_f32 = jax.block_until_ready(
        score_concat(first, second, w_cat, b_cat, w_single, b_single,
                     tanh_dtype=jnp.float32))
    out_cat = jax.block_until_ready(
        score_concat(first, second, w_cat, b_cat, w_single, b_single))

    np.testing.assert_allclose(
        np.asarray(out_bi), np.asarray(ref_bilinear(first, second, w_bi, b_bi)),
        rtol=1e-4, atol=1e-4)
    ref_c = np.asarray(ref_concat(first, second, w_cat, b_cat, w_single, b_single))
    np.testing.assert_allclose(np.asarray(out_cat_f32), ref_c, rtol=1e-4, atol=1e-4)
    np.testing.assert_allclose(np.asarray(out_cat), ref_c, **cat_tol)

    # ---- larger shapes: multi-step grid + ragged (non-divisible) edge blocks ----
    M2, N2 = 200, 650
    f2 = jax.random.normal(jax.random.PRNGKey(1), (M2, H), jnp.float32)
    s2 = jax.random.normal(jax.random.PRNGKey(2), (N2, H), jnp.float32)

    out_bi2 = jax.block_until_ready(score_bilinear(f2, s2, w_bi, b_bi))
    out_cat2_f32 = jax.block_until_ready(
        score_concat(f2, s2, w_cat, b_cat, w_single, b_single,
                     tanh_dtype=jnp.float32))
    out_cat2 = jax.block_until_ready(
        score_concat(f2, s2, w_cat, b_cat, w_single, b_single))

    np.testing.assert_allclose(
        np.asarray(out_bi2), np.asarray(ref_bilinear(f2, s2, w_bi, b_bi)),
        rtol=1e-4, atol=1e-4)
    ref_c2 = np.asarray(ref_concat(f2, s2, w_cat, b_cat, w_single, b_single))
    np.testing.assert_allclose(np.asarray(out_cat2_f32), ref_c2,
                               rtol=1e-4, atol=1e-4)
    np.testing.assert_allclose(np.asarray(out_cat2), ref_c2, **cat_tol)

    print("KERNEL_OK")
</pallas_src>

<mosaic_0001>
module attributes {stable_mosaic.version = 11 : i64} {
  func.func @_bilinear_score_kernel(%arg0: i32, %arg1: i32, %arg2: memref<8x32xf32, #tpu.memory_space<vmem>>, %arg3: memref<128x32xf32, #tpu.memory_space<vmem>>, %arg4: memref<32x32xf32, #tpu.memory_space<vmem>>, %arg5: memref<1x32xf32, #tpu.memory_space<vmem>>, %arg6: memref<8x128xf32, #tpu.memory_space<vmem>>) attributes {dimension_semantics = [#tpu.dimension_semantics<parallel>, #tpu.dimension_semantics<parallel>], iteration_bounds = array<i64: 1, 1>, scalar_prefetch = 0 : i64, scratch_operands = 0 : i64, tpu.core_type = #tpu.core_type<tc>, window_params = [{transform_indices = @transform_0, window_bounds = array<i64: 8, 32>}, {transform_indices = @transform_1, window_bounds = array<i64: 128, 32>}, {pipeline_mode = #tpu.pipeline_mode<synchronous>, transform_indices = @transform_2, window_bounds = array<i64: 32, 32>}, {pipeline_mode = #tpu.pipeline_mode<synchronous>, transform_indices = @transform_3, window_bounds = array<i64: 1, 32>}, {transform_indices = @transform_4, window_bounds = array<i64: 8, 128>}]} {
    %c0 = arith.constant 0 : index
    %c0_0 = arith.constant 0 : index
    %0 = vector.load %arg2[%c0, %c0_0] : memref<8x32xf32, #tpu.memory_space<vmem>>, vector<8x32xf32>
    %c0_1 = arith.constant 0 : index
    %c0_2 = arith.constant 0 : index
    %1 = vector.load %arg4[%c0_1, %c0_2] : memref<32x32xf32, #tpu.memory_space<vmem>>, vector<32x32xf32>
    %cst = arith.constant dense<0.000000e+00> : vector<8x32xf32>
    %2 = tpu.matmul %0, %1, %cst {dimension_numbers = #tpu.dot_dimension_numbers<[1], [1], [0], [0], [0, 0, 1, 0], [], []>} : vector<8x32xf32>, vector<32x32xf32>, vector<8x32xf32> -> vector<8x32xf32>
    %c0_3 = arith.constant 0 : index
    %c0_4 = arith.constant 0 : index
    %3 = vector.load %arg5[%c0_3, %c0_4] : memref<1x32xf32, #tpu.memory_space<vmem>>, vector<1x32xf32>
    %4 = vector.broadcast %3 : vector<1x32xf32> to vector<8x32xf32>
    %5 = arith.addf %2, %4 : vector<8x32xf32>
    %c0_5 = arith.constant 0 : index
    %c0_6 = arith.constant 0 : index
    %6 = vector.load %arg3[%c0_5, %c0_6] : memref<128x32xf32, #tpu.memory_space<vmem>>, vector<128x32xf32>
    %cst_7 = arith.constant dense<0.000000e+00> : vector<8x128xf32>
    %7 = tpu.matmul %5, %6, %cst_7 {dimension_numbers = #tpu.dot_dimension_numbers<[1], [1], [0], [0], [0, 0, 1, 0], [], []>} : vector<8x32xf32>, vector<128x32xf32>, vector<8x128xf32> -> vector<8x128xf32>
    %c0_8 = arith.constant 0 : index
    %c0_9 = arith.constant 0 : index
    %8 = vector.load %arg6[%c0_8, %c0_9] : memref<8x128xf32, #tpu.memory_space<vmem>>, vector<8x128xf32>
    tpu.vector_store %arg6[%c0_8, %c0_9], %7 {strides = array<i32>} : memref<8x128xf32, #tpu.memory_space<vmem>>, vector<8x128xf32>,
    return
  }
  func.func @transform_0(%arg0: i32, %arg1: i32) -> (i32, i32) {
    %c0_i32 = arith.constant 0 : i32
    %c0_i32_0 = arith.constant 0 : i32
    return %arg0, %c0_i32 : i32, i32
  }
  func.func @transform_1(%arg0: i32, %arg1: i32) -> (i32, i32) {
    %c0_i32 = arith.constant 0 : i32
    %c0_i32_0 = arith.constant 0 : i32
    return %arg1, %c0_i32 : i32, i32
  }
  func.func @transform_2(%arg0: i32, %arg1: i32) -> (i32, i32) {
    %c0_i32 = arith.constant 0 : i32
    %c0_i32_0 = arith.constant 0 : i32
    %c0_i32_1 = arith.constant 0 : i32
    return %c0_i32, %c0_i32_0 : i32, i32
  }
  func.func @transform_3(%arg0: i32, %arg1: i32) -> (i32, i32) {
    %c0_i32 = arith.constant 0 : i32
    %c0_i32_0 = arith.constant 0 : i32
    %c0_i32_1 = arith.constant 0 : i32
    return %c0_i32, %c0_i32_0 : i32, i32
  }
  func.func @transform_4(%arg0: i32, %arg1: i32) -> (i32, i32) {
    %c0_i32 = arith.constant 0 : i32
    return %arg0, %arg1 : i32, i32
  }
}

</mosaic_0001>

<bundles_post_ra>
// kernel: tpu_custom_call.1
= control target key start
LH: loop header
LB: loop body
LE: loop exit
PB: predicated region body
PF: predicated region fallthrough
CT: control target
= control target key end

     0   :  { %9 = vsyncpa [#allocation3], 0  ;;  %s656_s0 = inlined_call_operand.hbm [shape: f32[8,32], index: 0, kind: input, shape index: {}]   ;;  %s657_s1 = inlined_call_operand.hbm [shape: f32[8,32], index: 1, kind: input, shape index: {}]   ;;  %s658_s2 = inlined_call_operand.hbm [shape: f32[32,32], index: 2, kind: input, shape index: {}]   ;;  %s659_s3 = inlined_call_operand.vmem [shape: f32[1,32], index: 3, kind: input, shape index: {}]   ;;  %s660_s4 = inlined_call_operand.hbm [shape: f32[8,8], index: 4, kind: output, shape index: {}]  }
   0x1   :  { %10 = vsyncpa [#allocation6], 0 }
   0x2   :  { %11 = vsyncpa [#allocation4], 0  ;;  %s543_s15 = smov [#allocation2]   ;;  %s449_s19 = scalar_lea.hbm %s656_s0, 128 }
   0x3   :  { %s18_s16 = sshll.u32 %s543_s15, 4  ;;  %p450_p0 = scmp.ne.s32.totalorder %s656_s0, %s449_s19  ;;  %s19_s16 = int_to_ptr.vmem [resolvable:$true] %s18_s16 }
   0x4   :  { %p453_p1 = scmp.lt.u32.totalorder %s449_s19, %s656_s0 }
   0x6   :  { %p455_p2 = pnand %p453_p1, %p450_p0 }
   0x8   :  { %458 = shalt.err (!%p455_p2)
}
   0x9   :  { %s459_s24 = scalar_lea.vmem %s19_s16, 128  ;;  %p464_p4 = scmp.lt.s32.totalorder %s19_s16, %s19_s16 }
   0xa   :  { %p460_p3 = scmp.ne.s32.totalorder %s19_s16, %s459_s24  ;;  %p465_p5 = scmp.lt.s32.totalorder %s459_s24, %s459_s24 }
   0xc   :  { %p466_p6 = por %p465_p5, %p464_p4 }
   0xe   :  { %p467_p7 = pnand %p466_p6, %p460_p3 }
  0x10   :  { %470 = shalt.err (!%p467_p7)
}
  0x11   :  { %21 = dma.hbm_to_vmem [thread:$0]  %s656_s0, 128, %s19_s16, [#allocation3]  }
  0x12   :  { %26 = vsyncadd [#allocation6], 1920  ;;  %s544_s27 = smov [#allocation5]   ;;  %s471_s5 = scalar_lea.hbm %s657_s1, 128 }
  0x13   :  { %s27_s28 = sshll.u32 %s544_s27, 4  ;;  %p472_p8 = scmp.ne.s32.totalorder %s657_s1, %s471_s5  ;;  %s28_s28 = int_to_ptr.vmem [resolvable:$true] %s27_s28 }
  0x14   :  { %p475_p9 = scmp.lt.u32.totalorder %s471_s5, %s657_s1 }
  0x16   :  { %p477_p10 = pnand %p475_p9, %p472_p8 }
  0x18   :  { %480 = shalt.err (!%p477_p10)
}
  0x19   :  { %s481_s10 = scalar_lea.vmem %s28_s28, 128  ;;  %s485_s0 = scalar_lea.vmem %s28_s28, 2048 }
  0x1a   :  { %p482_p11 = scmp.ne.s32.totalorder %s28_s28, %s481_s10  ;;  %p486_p12 = scmp.lt.s32.totalorder %s28_s28, %s28_s28 }
  0x1b   :  { %p487_p13 = scmp.lt.s32.totalorder %s485_s0, %s481_s10 }
  0x1d   :  { %p488_p0 = por %p487_p13, %p486_p12 }
  0x1f   :  { %p489_p1 = pnand %p488_p0, %p482_p11 }
  0x21   :  { %492 = shalt.err (!%p489_p1)
}
  0x22   :  { %s545_s11 = smov 128   ;;  %s546_s12 = smov 8  }
  0x23   :  { %33 = dma.hbm_to_vmem [thread:$0]  %s657_s1, 128, %s28_s28, [#allocation6], %s545_s11, %s545_s11, %s546_s12  }
  0x24   :  { %s547_s15 = smov [#allocation7]   ;;  %s493_s19 = scalar_lea.hbm %s658_s2, 512 }
  0x25   :  { %s39_s16 = sshll.u32 %s547_s15, 4  ;;  %p494_p2 = scmp.ne.s32.totalorder %s658_s2, %s493_s19  ;;  %s40_s16 = int_to_ptr.vmem [resolvable:$true] %s39_s16 }
  0x26   :  { %p497_p3 = scmp.lt.u32.totalorder %s493_s19, %s658_s2 }
  0x28   :  { %p499_p4 = pnand %p497_p3, %p494_p2 }
  0x2a   :  { %502 = shalt.err (!%p499_p4)
}
  0x2b   :  { %s503_s24 = scalar_lea.vmem %s40_s16, 512  ;;  %p508_p6 = scmp.lt.s32.totalorder %s40_s16, %s40_s16 }
  0x2c   :  { %p504_p5 = scmp.ne.s32.totalorder %s40_s16, %s503_s24  ;;  %p509_p7 = scmp.lt.s32.totalorder %s503_s24, %s503_s24 }
  0x2e   :  { %p510_p8 = por %p509_p7, %p508_p6 }
  0x30   :  { %p511_p9 = pnand %p510_p8, %p504_p5 }
  0x32   :  { %514 = shalt.err (!%p511_p9)
}
  0x33   :  { %45 = dma.hbm_to_vmem [thread:$0]  %s658_s2, 512, %s40_s16, [#allocation6], %s545_s11, %s545_s11, %s546_s12  }
  0x34   :  { %537 = dma.done.wait [#allocation3], 128  }
  0x35   :  { %538 = vsyncadd [#allocation3], 4294967168 }
  0x36   :  { %539 = dma.done.wait [#allocation6], 2560  }
  0x37   :  { %540 = vsyncadd [#allocation6], 4294964736  ;;  %v548_v0 = vmov 0.0|0.0   ;;  %vm549_vm0 = vmmov 0   ;;  %v550_v1 = vmov 0.0   ;;  %vm69_vm1 = vcmask 261120  }
  0x38   :  { %400 = vmatprep.subr.bf16.mxu0 %v548_v0  ;;  %362 = vmatprep.mubr.msk.f32.mxu0 %vm549_vm0, %v550_v1  ;;  %v58_v2 = vld [vmem:[#allocation7] sm:$0xff]  ;;  %v59_v3 = vld [vmem:[#allocation7 + $0x8] sm:$0xff]  ;;  %vm615_vm2 = vmpackc.low %vm69_vm1, %vm69_vm1  ;;  %s551_s27 = smov [#allocation8]  }
  0x39   :  { %408 = vmatprep.subr.bf16.mxu1 %v548_v0  ;;  %397 = vmatprep.mubr.msk.f32.mxu1 %vm549_vm0, %v550_v1  ;;  %v401_v5 = vpack.c.bf16 %v59_v3, %v58_v2  ;;  %v155_v6 = vld [vmem:[#allocation5] sm:$0xff]  ;;  %v156_v7 = vld [vmem:[#allocation5 + $0x8] sm:$0xff]  ;;  %v60_v9 = vld [vmem:[#allocation7 + $0x10] sm:$0xff]  ;;  %s299_s28 = sshll.u32 %s551_s27, 4  ;;  %s300_s28 = int_to_ptr.vmem [resolvable:$true] %s299_s28 }
  0x3a   :  { %v409_v8 = vpack.c.bf16 %v156_v7, %v155_v6  ;;  %v61_v10 = vld [vmem:[#allocation7 + $0x18] sm:$0xff]  ;;  %v157_v11 = vld [vmem:[#allocation5 + $0x10] sm:$0xff]  ;;  %v159_v15 = vld [vmem:[#allocation5 + $0x20] sm:$0xff]  ;;  %s515_s29 = scalar_lea.vmem %s300_s28, 128  ;;  %p520_p11 = scmp.lt.s32.totalorder %s300_s28, %s300_s28 }
  0x3b   :  { %403 = vmatpush3.bf16.xpose.msk.msra.mxu0 %vm615_vm2, %v401_v5  ;;  %v158_v12 = vld [vmem:[#allocation5 + $0x18] sm:$0xff]  ;;  %v405_v13 = vpack.c.bf16 %v61_v10, %v60_v9  ;;  %v160_v16 = vld [vmem:[#allocation5 + $0x28] sm:$0xff]  ;;  %v161_v19 = vld [vmem:[#allocation5 + $0x30] sm:$0xff]  ;;  %p516_p10 = scmp.ne.s32.totalorder %s300_s28, %s515_s29  ;;  %p521_p12 = scmp.lt.s32.totalorder %s515_s29, %s515_s29 }
  0x3c   :  { %404 = vmatprep.subr.bf16.mxu0 %v548_v0  ;;  %411 = vmatpush3.bf16.xpose.msk.msra.mxu1 %vm615_vm2, %v409_v8  ;;  %v413_v14 = vpack.c.bf16 %v158_v12, %v157_v11  ;;  %v57_v17 = vld [vmem:[#allocation2] sm:$0xff]  ;;  %v417_v18 = vpack.c.bf16 %v160_v16, %v159_v15  ;;  %v163_v22 = vld [vmem:[#allocation5 + $0x40] sm:$0xff]  ;;  %v164_v23 = vld [vmem:[#allocation5 + $0x48] sm:$0xff] }
  0x3d   :  { %412 = vmatprep.subr.bf16.mxu1 %v548_v0  ;;  %v162_v20 = vld [vmem:[#allocation5 + $0x38] sm:$0xff]  ;;  %v425_v24 = vpack.c.bf16 %v164_v23, %v163_v22  ;;  %v165_v25 = vld [vmem:[#allocation5 + $0x50] sm:$0xff]  ;;  %v167_v28 = vld [vmem:[#allocation5 + $0x60] sm:$0xff]  ;;  %p522_p13 = por %p521_p12, %p520_p11 }
  0x3e   :  { %v421_v21 = vpack.c.bf16 %v162_v20, %v161_v19  ;;  %v166_v26 = vld [vmem:[#allocation5 + $0x58] sm:$0xff]  ;;  %v168_v29 = vld [vmem:[#allocation5 + $0x68] sm:$0xff]  ;;  %v169_v31 = vld [vmem:[#allocation5 + $0x70] sm:$0xff] }
  0x3f   :  { %v429_v27 = vpack.c.bf16 %v166_v26, %v165_v25  ;;  %v433_v30 = vpack.c.bf16 %v168_v29, %v167_v28  ;;  %v170_v32 = vld [vmem:[#allocation5 + $0x78] sm:$0xff]  ;;  %p523_p0 = pnand %p522_p13, %p516_p10 }
  0x40   :  { %v437_v33 = vpack.c.bf16 %v170_v32, %v169_v31  ;;  %v309_v34 = vld [vmem:[%s659_s3] ss:$0 sm:$0xff] }
  0x43   :  { %407 = vmatpush3.bf16.xpose.msk.msra.mxu0 %vm615_vm2, %v405_v13 }
  0x44   :  { %415 = vmatpush3.bf16.xpose.msk.msra.mxu1 %vm615_vm2, %v413_v14 }
  0x45   :  { %416 = vmatprep.subr.bf16.mxu1 %v548_v0 }
  0x4a   :  { %363 = vmatmul.mubr.msk.f32.vlgmr.msra.gmra.mrb[0].mxu0 %vm69_vm1, %v57_v17 }
  0x4c   :  { %419 = vmatpush3.bf16.xpose.msk.msra.mxu1 %vm615_vm2, %v417_v18 }
  0x4d   :  { %420 = vmatprep.subr.bf16.mxu1 %v548_v0 }
  0x54   :  { %423 = vmatpush3.bf16.xpose.msk.msra.mxu1 %vm615_vm2, %v421_v21 }
  0x55   :  { %424 = vmatprep.subr.bf16.mxu1 %v548_v0 }
  0x5c   :  { %427 = vmatpush3.bf16.xpose.msk.msra.mxu1 %vm615_vm2, %v425_v24 }
  0x5d   :  { %428 = vmatprep.subr.bf16.mxu1 %v548_v0 }
  0x64   :  { %431 = vmatpush3.bf16.xpose.msk.msra.mxu1 %vm615_vm2, %v429_v27 }
  0x65   :  { %432 = vmatprep.subr.bf16.mxu1 %v548_v0 }
  0x6c   :  { %435 = vmatpush3.bf16.xpose.msk.msra.mxu1 %vm615_vm2, %v433_v30 }
  0x6d   :  { %436 = vmatprep.subr.bf16.mxu1 %v548_v0 }
  0x74   :  { %439 = vmatpush3.bf16.xpose.msk.msra.mxu1 %vm615_vm2, %v437_v33 }
 0x11d   :  { %v151_v35 = vpop.f32.mrb[0].mxu0 }
 0x11e   :  { %v152_v36 = vadd.f32 %v309_v34, %v151_v35  ;;  %v364_v37 = vpop.f32.mrb[1].mxu0 }
 0x120   :  { %398 = vmatmul.mubr.msk.f32.vlgmr.msra.gmra.mrb[0].mxu1 %vm69_vm1, %v152_v36 }
 0x1f3   :  { %v288_v38 = vpop.f32.mrb[0].mxu1 }
 0x1f4   :  { %292 = vst [vmem:[#allocation8] sm:$0xff] %v288_v38  ;;  %v399_v39 = vpop.f32.mrb[1].mxu1 }
 0x1f5   :  { %526 = shalt.err (!%p523_p0)
}
 0x1f6   :  { %s527_s5 = scalar_lea.hbm %s660_s4, 128 }
 0x1f7   :  { %p528_p1 = scmp.ne.s32.totalorder %s660_s4, %s527_s5  ;;  %p531_p2 = scmp.lt.u32.totalorder %s527_s5, %s660_s4 }
 0x1f9   :  { %p533_p3 = pnand %p531_p2, %p528_p1 }
 0x1fb   :  { %536 = shalt.err (!%p533_p3)
}
 0x1fc   :  { %302 = dma.vmem_to_hbm [thread:$0]  %s300_s28, 128, %s660_s4, [#allocation4]  }
 0x1fd   :  { %541 = dma.done.wait [#allocation4], 128  }
 0x1fe   :  { %542 = vsyncadd [#allocation4], 4294967168 }
 0x1ff   :  { %306 = vsyncpa [#allocation3], 1 }
 0x200   :  { %307 = vsyncpa [#allocation6], 1 }
 0x201   :  { %308 = vsyncpa [#allocation4], 1 }

</bundles_post_ra>
